<compile_context>
chip_gen: v5e
topology: v5e:2x2
jax: 0.10.0
libtpu: 0.0.40
codegen_flags: <defaults>
</compile_context>

<pallas_src>
import math
import numpy as np
import jax
import jax.numpy as jnp
from jax import lax
from jax.experimental import pallas as pl
from jax.experimental.pallas import tpu as pltpu

KLEN = 31
RAD = 15  # (KLEN - 1) // 2


# ----------------------------- parameter init -------------------------------
def _norm_cdf(v):
    return 0.5 * (1.0 + math.erf(v / math.sqrt(2.0)))


def _get_kernel_1d(kernlen=16, nsig=3):
    """1-D factor of the module's gaussian init (diff of the normal CDF)."""
    interval = (2 * nsig + 1.0) / kernlen
    x = np.linspace(-nsig - interval / 2.0, nsig + interval / 2.0, kernlen + 1)
    cdf = np.array([_norm_cdf(v) for v in x], dtype=np.float64)
    return np.diff(cdf)


def _get_kernel(kernlen=16, nsig=3):
    """Deterministic re-implementation of the module's 2-D gaussian init."""
    kern1d = _get_kernel_1d(kernlen, nsig)
    kernel_raw = np.sqrt(np.outer(kern1d, kern1d))
    return kernel_raw / kernel_raw.sum()


def _separable_factor(kernlen=KLEN, nsig=4):
    # kernel = sqrt(outer(k1d,k1d)) / sum == outer(g, g) with g = sqrt(k1d)/sum(sqrt(k1d))
    g = np.sqrt(_get_kernel_1d(kernlen, nsig))
    return g / g.sum()


def _band_toeplitz(n, g):
    """T[a, b] = g[a - b + RAD] (zero outside the 31-tap band)."""
    a = np.arange(n)[:, None]
    b = np.arange(n)[None, :]
    d = a - b + RAD
    valid = (d >= 0) & (d < len(g))
    return np.where(valid, g[np.clip(d, 0, len(g) - 1)], 0.0)


# --------------------------------- kernels -----------------------------------
def gate_kernel(th_ref, tw_ref, att_ref, gate_ref):
    """Per-batch gate: separable 31x31 gaussian conv + min-max norm + max(.,att).

    th_ref   : VMEM (H, H)        left band-Toeplitz (vertical 31-tap conv)
    tw_ref   : VMEM (W, W)        right band-Toeplitz (horizontal 31-tap conv)
    att_ref  : VMEM (1, 1, H, W)  attention plane for this batch
    gate_ref : VMEM (1, 1, H, W)  output gate plane
    """
    att = att_ref[0, 0]                                                   # (H, W)
    # Separable 31x31 "same" conv (zero padding baked into the Toeplitz boundary
    # rows), executed on the MXU.  Once per batch -> off the roofline.
    tmp = jnp.dot(att, tw_ref[...],
                  preferred_element_type=jnp.float32,
                  precision=lax.Precision.HIGHEST)
    soft = jnp.dot(th_ref[...], tmp,
                   preferred_element_type=jnp.float32,
                   precision=lax.Precision.HIGHEST)
    # Per-(batch, channel) min-max normalisation (single attention channel).
    mn = jnp.min(soft)
    mx = jnp.max(soft)
    norm = (soft - mn) / (mx - mn + jnp.float32(1e-8))
    gate_ref[0, 0] = jnp.maximum(norm, att)


def sa_mul_kernel(gate_ref, x_ref, o_ref):
    """HBM-roofline broadcast multiply on a lane-dense (TC, H*W) tile.

    gate_ref : VMEM (1, 1, HW)   flattened gate for this batch
    x_ref    : VMEM (1, TC, HW)  channel tile of x
    o_ref    : VMEM (1, TC, HW)  output tile
    """
    o_ref[0] = (x_ref[0] * gate_ref[0]).astype(o_ref.dtype)


# -------------------------------- tiling -------------------------------------
def _vmem_capacity_bytes():
    try:
        return int(pltpu.get_tpu_info().vmem_capacity_bytes)
    except Exception:
        return 64 * 1024 * 1024  # conservative default (v7x physical VMEM)


def _pick_channel_tile(C, HW, budget_bytes, min_tiles=1):
    """Channel tile for a (1, TC, HW) f32 block under ~budget_bytes."""
    bytes_per_ch = HW * 4
    cap = max(1, int(budget_bytes) // bytes_per_ch)
    if min_tiles > 1:
        # Keep at least `min_tiles` grid steps on the channel axis (v7x megacore
        # when B == 1).
        cap = min(cap, max(1, -(-C // min_tiles)))
    if C <= cap:
        return C
    # TC < C: keep the block's second-minor dim a multiple of 8 (sublane rule);
    # prefer an exact divisor of C so there is no masked tail block.
    top = (min(cap, C) // 8) * 8
    if top >= 8:
        tc = top
        while tc >= 8 and C % tc:
            tc -= 8
        return tc if tc >= 8 else top
    # cap < 8: a single channel row already exceeds budget/8 (very large H*W).
    # Take the smallest sublane-legal tile; vmem_limit is sized from the actual
    # block bytes by the caller.
    # TODO(synk): also tile the H*W axis if an 8-channel block ever exceeds
    # physical VMEM (not reachable for realistic SA feature maps).
    return min(8, C)


# -------------------------------- wrapper ------------------------------------
def sa_forward(attention, x, *, nsig=4):
    """attention: (B, 1, H, W), x: (B, C, H, W)."""
    B, C, H, W = x.shape
    assert attention.shape == (B, 1, H, W)
    HW = H * W

    g = _separable_factor(KLEN, nsig)
    th = jnp.asarray(_band_toeplitz(H, g).T, dtype=jnp.float32)  # (H, H)
    tw = jnp.asarray(_band_toeplitz(W, g), dtype=jnp.float32)    # (W, W)
    att_f32 = attention.astype(jnp.float32)

    # --- stage 1: per-batch gate (tiny, once per batch) ----------------------
    gate = pl.pallas_call(
        gate_kernel,
        out_shape=jax.ShapeDtypeStruct((B, 1, H, W), jnp.float32),
        grid=(B,),
        in_specs=[
            pl.BlockSpec((H, H), lambda b: (0, 0)),              # Th
            pl.BlockSpec((W, W), lambda b: (0, 0)),              # Tw
            pl.BlockSpec((1, 1, H, W), lambda b: (b, 0, 0, 0)),  # attention
        ],
        out_specs=pl.BlockSpec((1, 1, H, W), lambda b: (b, 0, 0, 0)),
        compiler_params=pltpu.CompilerParams(
            dimension_semantics=("parallel",)),
    )(th, tw, att_f32)

    gate_flat = gate.reshape(B, 1, HW)   # contiguous relabel (free in XLA)
    x_flat = x.reshape(B, C, HW)

    # --- stage 2: HBM-roofline gated multiply of x ----------------------------
    vmem_cap = _vmem_capacity_bytes()
    budget = int(min(8 << 20, max(2 << 20, vmem_cap // 10)))  # ~6-8 MiB / block
    min_tiles = 2 if B == 1 else 1        # keep both v7x TensorCores busy
    TC = _pick_channel_tile(C, HW, budget, min_tiles=min_tiles)
    n_ct = pl.cdiv(C, TC)

    block_bytes = TC * HW * x.dtype.itemsize
    gate_bytes = HW * 4
    needed = 4 * block_bytes + 2 * gate_bytes + (4 << 20)  # in/out double-buffered
    vmem_limit = int(min(max(32 << 20, needed), vmem_cap - (8 << 20)))

    out_flat = pl.pallas_call(
        sa_mul_kernel,
        out_shape=jax.ShapeDtypeStruct((B, C, HW), x.dtype),
        grid=(B, n_ct),
        in_specs=[
            pl.BlockSpec((1, 1, HW), lambda b, c: (b, 0, 0)),    # gate (flattened)
            pl.BlockSpec((1, TC, HW), lambda b, c: (b, c, 0)),   # x (flattened)
        ],
        out_specs=pl.BlockSpec((1, TC, HW), lambda b, c: (b, c, 0)),
        compiler_params=pltpu.CompilerParams(
            dimension_semantics=("parallel", "parallel"),
            vmem_limit_bytes=vmem_limit),
    )(gate_flat, x_flat)
    return out_flat.reshape(B, C, H, W)


# ------------------------------- reference ----------------------------------
def sa_ref(attention, x, gk2d):
    """Pure-JAX reference mirroring the PyTorch forward."""
    gk = gk2d[None, None]  # OIHW (1, 1, 31, 31)
    soft = lax.conv_general_dilated(
        attention, gk, window_strides=(1, 1),
        padding=((RAD, RAD), (RAD, RAD)),
        dimension_numbers=("NCHW", "OIHW", "NCHW"),
        precision=lax.Precision.HIGHEST)
    mx = soft.max(axis=(2, 3), keepdims=True)
    mn = soft.min(axis=(2, 3), keepdims=True)
    norm = (soft - mn) / (mx - mn + 1e-8)
    return x * jnp.maximum(norm, attention)


if __name__ == "__main__":
    key = jax.random.PRNGKey(0)
    gk2d = jnp.asarray(np.float32(_get_kernel(KLEN, 4)))  # module uses nsig=4

    # Small canonical shape + one realistic-ish SA shape (B=1 -> forced channel
    # tiling / dual-parallel grid; W=44 -> non-128-multiple lane tail).
    for (B, C, H, W) in [(2, 4, 16, 16), (1, 32, 44, 44)]:
        k1, k2, key = jax.random.split(key, 3)
        attention = jax.random.uniform(k1, (B, 1, H, W), dtype=jnp.float32)
        x = jax.random.normal(k2, (B, C, H, W), dtype=jnp.float32)

        out = jax.block_until_ready(sa_forward(attention, x))
        ref = sa_ref(attention, x, gk2d)
        err = float(np.max(np.abs(np.asarray(out) - np.asarray(ref))))
        assert np.allclose(np.asarray(out), np.asarray(ref),
                           atol=5e-4, rtol=5e-4), (
            "shape %s max abs err %g" % ((B, C, H, W), err))

    print("KERNEL_OK")
</pallas_src>

<mosaic_0001>
module attributes {stable_mosaic.version = 11 : i64} {
  func.func @gate_kernel(%arg0: i32, %arg1: memref<16x16xf32, #tpu.memory_space<vmem>>, %arg2: memref<16x16xf32, #tpu.memory_space<vmem>>, %arg3: memref<1x1x16x16xf32, #tpu.memory_space<vmem>>, %arg4: memref<1x1x16x16xf32, #tpu.memory_space<vmem>>) attributes {dimension_semantics = [#tpu.dimension_semantics<parallel>], iteration_bounds = array<i64: 2>, scalar_prefetch = 0 : i64, scratch_operands = 0 : i64, tpu.core_type = #tpu.core_type<tc>, window_params = [{pipeline_mode = #tpu.pipeline_mode<synchronous>, transform_indices = @transform_0, window_bounds = array<i64: 16, 16>}, {pipeline_mode = #tpu.pipeline_mode<synchronous>, transform_indices = @transform_1, window_bounds = array<i64: 16, 16>}, {transform_indices = @transform_2, window_bounds = array<i64: 1, 1, 16, 16>}, {transform_indices = @transform_3, window_bounds = array<i64: 1, 1, 16, 16>}]} {
    %c0 = arith.constant 0 : index
    %c0_0 = arith.constant 0 : index
    %c0_1 = arith.constant 0 : index
    %c0_2 = arith.constant 0 : index
    %0 = vector.load %arg3[%c0, %c0_0, %c0_1, %c0_2] : memref<1x1x16x16xf32, #tpu.memory_space<vmem>>, vector<1x1x16x16xf32>
    %1 = vector.shape_cast %0 : vector<1x1x16x16xf32> to vector<16x16xf32>
    %c0_3 = arith.constant 0 : index
    %c0_4 = arith.constant 0 : index
    %2 = vector.load %arg2[%c0_3, %c0_4] : memref<16x16xf32, #tpu.memory_space<vmem>>, vector<16x16xf32>
    %cst = arith.constant dense<0.000000e+00> : vector<16x16xf32>
    %3 = tpu.matmul %1, %2, %cst {dimension_numbers = #tpu.dot_dimension_numbers<[1], [0], [0], [1], [0, 0, 1, 1], [], []>, precision = #tpu.contract_precision<fp32>} : vector<16x16xf32>, vector<16x16xf32>, vector<16x16xf32> -> vector<16x16xf32>
    %c0_5 = arith.constant 0 : index
    %c0_6 = arith.constant 0 : index
    %4 = vector.load %arg1[%c0_5, %c0_6] : memref<16x16xf32, #tpu.memory_space<vmem>>, vector<16x16xf32>
    %cst_7 = arith.constant dense<0.000000e+00> : vector<16x16xf32>
    %5 = tpu.matmul %4, %3, %cst_7 {dimension_numbers = #tpu.dot_dimension_numbers<[1], [0], [0], [1], [0, 0, 1, 1], [], []>, precision = #tpu.contract_precision<fp32>} : vector<16x16xf32>, vector<16x16xf32>, vector<16x16xf32> -> vector<16x16xf32>
    %6 = vector.shape_cast %5 : vector<16x16xf32> to vector<1x16x16xf32>
    %cst_8 = arith.constant dense<0x7F800000> : vector<1xf32>
    %7 = vector.multi_reduction <minimumf>, %6, %cst_8 [1, 2] : vector<1x16x16xf32> to vector<1xf32>
    %8 = vector.shape_cast %7 : vector<1xf32> to vector<1x1x1xf32>
    %9 = vector.extract %8[0, 0, 0] : f32 from vector<1x1x1xf32>
    %10 = vector.shape_cast %5 : vector<16x16xf32> to vector<1x16x16xf32>
    %cst_9 = arith.constant dense<0xFF800000> : vector<1xf32>
    %11 = vector.multi_reduction <maximumf>, %10, %cst_9 [1, 2] : vector<1x16x16xf32> to vector<1xf32>
    %12 = vector.shape_cast %11 : vector<1xf32> to vector<1x1x1xf32>
    %13 = vector.extract %12[0, 0, 0] : f32 from vector<1x1x1xf32>
    %14 = vector.broadcast %9 : f32 to vector<16x16xf32>
    %15 = arith.subf %5, %14 : vector<16x16xf32>
    %16 = arith.subf %13, %9 : f32
    %cst_10 = arith.constant 9.99999993E-9 : f32
    %17 = arith.addf %16, %cst_10 : f32
    %18 = vector.broadcast %17 : f32 to vector<16x16xf32>
    %19 = arith.divf %15, %18 : vector<16x16xf32>
    %20 = arith.maximumf %19, %1 : vector<16x16xf32>
    %c0_11 = arith.constant 0 : index
    %c0_12 = arith.constant 0 : index
    %c0_13 = arith.constant 0 : index
    %c0_14 = arith.constant 0 : index
    %21 = vector.load %arg4[%c0_11, %c0_12, %c0_13, %c0_14] : memref<1x1x16x16xf32, #tpu.memory_space<vmem>>, vector<1x1x16x16xf32>
    %22 = vector.shape_cast %21 : vector<1x1x16x16xf32> to vector<16x16xf32>
    %23 = vector.shape_cast %20 : vector<16x16xf32> to vector<1x1x16x16xf32>
    tpu.vector_store %arg4[%c0_11, %c0_12, %c0_13, %c0_14], %23 {strides = array<i32>} : memref<1x1x16x16xf32, #tpu.memory_space<vmem>>, vector<1x1x16x16xf32>,
    return
  }
  func.func @transform_0(%arg0: i32) -> (i32, i32) {
    %c0_i32 = arith.constant 0 : i32
    %c0_i32_0 = arith.constant 0 : i32
    %c0_i32_1 = arith.constant 0 : i32
    return %c0_i32, %c0_i32_0 : i32, i32
  }
  func.func @transform_1(%arg0: i32) -> (i32, i32) {
    %c0_i32 = arith.constant 0 : i32
    %c0_i32_0 = arith.constant 0 : i32
    %c0_i32_1 = arith.constant 0 : i32
    return %c0_i32, %c0_i32_0 : i32, i32
  }
  func.func @transform_2(%arg0: i32) -> (i32, i32, i32, i32) {
    %c0_i32 = arith.constant 0 : i32
    %c0_i32_0 = arith.constant 0 : i32
    %c0_i32_1 = arith.constant 0 : i32
    %c0_i32_2 = arith.constant 0 : i32
    return %arg0, %c0_i32, %c0_i32_0, %c0_i32_1 : i32, i32, i32, i32
  }
  func.func @transform_3(%arg0: i32) -> (i32, i32, i32, i32) {
    %c0_i32 = arith.constant 0 : i32
    %c0_i32_0 = arith.constant 0 : i32
    %c0_i32_1 = arith.constant 0 : i32
    %c0_i32_2 = arith.constant 0 : i32
    return %arg0, %c0_i32, %c0_i32_0, %c0_i32_1 : i32, i32, i32, i32
  }
}

</mosaic_0001>

<bundles_post_ra>
// kernel: tpu_custom_call.1
= control target key start
LH: loop header
LB: loop body
LE: loop exit
PB: predicated region body
PF: predicated region fallthrough
CT: control target
= control target key end

     0   :  { %8 = vsyncpa [#allocation3], 0  ;;  %s1245_s0 = inlined_call_operand.hbm [shape: f32[16,16], index: 0, kind: input, shape index: {}]   ;;  %s1246_s1 = inlined_call_operand.hbm [shape: f32[16,16], index: 1, kind: input, shape index: {}]   ;;  %s1247_s2 = inlined_call_operand.hbm [shape: f32[2,1,16,16], index: 2, kind: input, shape index: {}]   ;;  %s1248_s3 = inlined_call_operand.hbm [shape: f32[2,1,16,16], index: 3, kind: output, shape index: {}]  }
   0x1   :  { %9 = vsyncpa [#allocation6], 0 }
   0x2   :  { %10 = vsyncpa [#allocation4], 0 }
   0x3   :  { %12 = vsyncpa [#allocation4 + $0x1], 0  ;;  %s1068_s12 = smov 0   ;;  %s1070_s13 = smov 0  }
   0x4   :  { %s1072_s14 = smov 0   ;;  %s1074_s15 = smov 0  }
   0x5 LB: > { %s1089_s16 = sadd.s32 4294967295, %s1040_s15   ;;  %s779_s17 = sadd.s32 4294967294, %s1040_s15   ;;  %s1040_s15 = sphi %s1074_s15, %s1258_s15   ;;  %s1036_s14 = sphi %s1072_s14, %s1257_s14   ;;  %s1032_s13 = sphi %s1070_s13, %s1256_s13   ;;  %s1028_s12 = sphi %s1068_s12, %s1255_s12  }
   0x6   : > { %p80_p0 = scmp.ne.s32.totalorder %s1032_s13, %s1028_s12  ;;  %p81_p1 = scmp.eq.s32.totalorder %s1089_s16, 0 }
   0x7   : > { %p104_p2 = scmp.eq.s32.totalorder %s1089_s16, 1  ;;  %p110_p3 = scmp.eq.s32.totalorder %s779_s17, 1 }
   0x8   : > { %p1098_p4 = por %p81_p1, %p80_p0  ;;  %p780_p5 = scmp.ge.s32.totalorder %s1040_s15, 1 }
   0x9   : > { %p1103_p6 = por %p110_p3, %p80_p0  ;;  %p117_p7 = scmp.lt.s32.totalorder %s1040_s15, 3 }
   0xa   : > { %s128_s22 = sshll.u32 %s1245_s0, 4  ;;  %s1042_s24 = smov [#allocation2]   ;;  %s129_s22 = int_to_ptr.hbm [resolvable:$true] %s128_s22 }
   0xb   : > { %p1111_p8 = pnand %p780_p5, %p117_p7  ;;  %s130_s25 = sshll.u32 %s1042_s24, 4  ;;  %s131_s25 = int_to_ptr.vmem [resolvable:$true] %s130_s25 }
   0xc   : > { %s142_s28 = sshll.u32 %s1246_s1, 4  ;;  %s1043_s29 = smov 128   ;;  %s143_s28 = int_to_ptr.hbm [resolvable:$true] %s142_s28 }
   0xd   : > { %p815_p9 = pneg %p1111_p8  ;;  %s1044_s30 = smov 8  }
   0xe   : > { %s1045_s4 = smov [#allocation5]   ;;  %s1130_s6 = sadd.s32 1, %s1040_s15  }
   0xf   : > { %p816_p10 = pnand %p815_p9, %p81_p1  ;;  %s144_s5 = sshll.u32 %s1045_s4, 4  ;;  %s145_s5 = int_to_ptr.vmem [resolvable:$true] %s144_s5 }
  0x10   : > { %s67_s7 = sadd.s32 1, %s1036_s14  ;;  %s64_s8 = ssub.s32 %s1040_s15, %s1130_s6 }
  0x11   : > { %818 = dma.hbm_to_vmem [thread:$0]  (!%p816_p10), %s129_s22, 256, %s131_s25, [#allocation3], %s1043_s29, %s1043_s29, %s1044_s30  }
  0x12   : > { %821 = dma.hbm_to_vmem [thread:$0]  (!%p816_p10), %s143_s28, 256, %s145_s5, [#allocation6], %s1043_s29, %s1043_s29, %s1044_s30  }
  0x13   : > { %p74_p12 = scmp.ne.s32.totalorder %s1036_s14, %s1032_s13  ;;  %p65_p13 = scmp.eq.s32.totalorder %s64_s8, 0 }
  0x14   : > { %p75_p0 = scmp.eq.s32.totalorder %s1040_s15, 0  ;;  %p832_p7 = scmp.lt.s32.totalorder %s1040_s15, 2 }
  0x15   : > { %p1140_p3 = por %p104_p2, %p74_p12  ;;  %s158_s11 = sand.u32 1, %s1040_s15  }
  0x16   : > { %s1145_s10 = scalar_select %p65_p13, %s1036_s14, %s67_s7  }
  0x17   : > { %p76_p5 = por %p75_p0, %p74_p12  ;;  %s160_s17 = sand.u32 1, %s1036_s14  }
  0x18   : > { %s784_s20 = sshll.u32 %s160_s17, 4  ;;  %s797_s21 = sshll.u32 %s1040_s15, 4 }
  0x19   : > { %s167_s25 = scalar_lea.hbm %s1247_s2, %s797_s21  ;;  %s162_s27 = scalar_lea.vmem [#allocation7], %s784_s20 }
  0x1a   : > { %s168_s26 = sshll.u32 %s167_s25, 4  ;;  %s170_s28 = sshll.u32 %s162_s27, 4  ;;  %s169_s26 = int_to_ptr.hbm [resolvable:$true] %s168_s26  ;;  %s171_s28 = int_to_ptr.vmem [resolvable:$true] %s170_s28 }
  0x1b   : > { %p1154_p2 = pnand %p832_p7, %p76_p5  ;;  %s159_s5 = scalar_lea.sflag [#allocation3], %s158_s11 }
  0x1c   : > { %s936_s7 = sshra.s32 %s169_s26, 4  ;;  %s943_s20 = scalar_lea.hbm %s1247_s2, 32  ;;  %s937_s7 = int_to_ptr.hbm [resolvable:$true] %s936_s7 }
  0x1d   : > { %s938_s8 = scalar_lea.hbm %s937_s7, 16  ;;  %p940_p10 = pneg %p1154_p2 }
  0x1e   : > { %p939_p9 = scmp.ne.s32.totalorder %s937_s7, %s938_s8  ;;  %p944_p0 = scmp.lt.s32.totalorder %s937_s7, %s1247_s2 }
  0x1f   : > { %p945_p5 = scmp.lt.s32.totalorder %s943_s20, %s938_s8 }
  0x20   : > { %p941_p12 = pnand %p940_p10, %p939_p9 }
  0x21   : > { %p946_p7 = por %p945_p5, %p944_p0 }
  0x22   : > { %p942_p13 = pneg %p941_p12 }
  0x24   : > { %p947_p11 = pnand %p946_p7, %p942_p13 }
  0x26   : > { %950 = shalt.err (!%p947_p11)
}
  0x27   : > { %825 = dma.hbm_to_vmem [thread:$0]  (!%p1154_p2), %s169_s26, 256, %s171_s28, %s159_s5, %s1043_s29, %s1043_s29, %s1044_s30  }
  0x28   : > { %182 = sbr.rel (%p1111_p8) target bundleno = 610 (0x262), region = 32 }
  0x2d   : > { %1011 = dma.done.wait (%p81_p1), [#allocation3], 256  }
  0x2e   : > { %1013 = vsyncadd (%p81_p1), [#allocation3], 4294967040 }
  0x2f   : > { %1015 = dma.done.wait (%p81_p1), [#allocation6], 256  }
  0x30   : > { %1017 = vsyncadd (%p81_p1), [#allocation6], 4294967040  ;;  %s194_s29 = sand.u32 1, %s1089_s16   ;;  %s196_s30 = sand.u32 1, %s1032_s13  }
  0x31   : > { %s1185_s23 = sshll.u32 %s196_s30, 4  ;;  %s195_s11 = scalar_lea.sflag [#allocation3], %s194_s29 }
  0x32   : > { %s198_s25 = scalar_lea.vmem [#allocation7], %s1185_s23 }
  0x33   : > { %1019 = dma.done.wait (%p1098_p4), %s195_s11, 256  }
  0x34   : > { %1021 = vsyncadd (%p1098_p4), %s195_s11, 4294967040  ;;  %vm226_vm0 = vcmask 130048   ;;  %v225_v0 = vld [vmem:[#allocation5 + $0x8] sm:$0xff]  ;;  %v224_v1 = vld [vmem:[#allocation5] sm:$0xff]  ;;  %s798_s4 = sshll.u32 %s1089_s16, 4  ;;  %s221_s17 = scalar_lea.vmem [#allocation8], %s1185_s23 }
  0x35   : > { %v1192_v2 = vld [vmem:[%s198_s25] sm:$0xff]  ;;  %v247_v3 = vand.u32 4294901760, %v225_v0  ;;  %v249_v4 = vand.u32 4294901760, %v224_v1  ;;  %v1196_v6 = vld [vmem:[%s198_s25 + $0x8] sm:$0xff]  ;;  %s683_s8 = scalar_lea.hbm %s1248_s3, %s798_s4  ;;  %s684_s16 = sshll.u32 %s221_s17, 4  ;;  %s685_s16 = int_to_ptr.vmem [resolvable:$true] %s684_s16 }
  0x36   : > { %v228_v5 = vsel %vm226_vm0, %v1192_v2, 0  ;;  %v231_v8 = vsel %vm226_vm0, %v1196_v6, 0  ;;  %v423_v31 = vld [vmem:[#allocation2] sm:$0xff]  ;;  %v424_v41 = vld [vmem:[#allocation2 + $0x8] sm:$0xff]  ;;  %s686_s21 = sshll.u32 %s683_s8, 4  ;;  %s672_s20 = scalar_lea.sflag [#allocation4], %s196_s30  ;;  %s687_s21 = int_to_ptr.hbm [resolvable:$true] %s686_s21 }
  0x37   : > { %v251_v7 = vand.u32 4294901760, %v228_v5  ;;  %v283_v9 = vsub.f32 %v225_v0, %v247_v3  ;;  %248 = vmatpush.msra.mxu0 %v247_v3  ;;  %v289_v10 = vsub.f32 %v224_v1, %v249_v4  ;;  %349 = vmatpush.msra.mxu3 %v247_v3  ;;  %v259_v11 = vand.u32 4294901760, %v231_v8  ;;  %s980_s22 = sshra.s32 %s687_s21, 4  ;;  %s986_s11 = scalar_lea.hbm %s1248_s3, 32  ;;  %s981_s22 = int_to_ptr.hbm [resolvable:$true] %s980_s22 }
  0x38   : > { %v426_v35 = vsel %vm226_vm0, %v423_v31, 0  ;;  %v429_v47 = vsel %vm226_vm0, %v424_v41, 0  ;;  %s982_s24 = scalar_lea.hbm %s981_s22, 16  ;;  %p987_p11 = scmp.lt.s32.totalorder %s981_s22, %s1248_s3 }
  0x39   : > { %v252_v12 = vsub.f32 %v228_v5, %v251_v7  ;;  %319 = vmatpush.msra.mxu2 %v283_v9  ;;  %250 = vmatpush.msra.mxu0 %v249_v4  ;;  %v284_v13 = vand.u32 4294901760, %v283_v9  ;;  %v290_v14 = vand.u32 4294901760, %v289_v10  ;;  %v260_v15 = vsub.f32 %v231_v8, %v259_v11  ;;  %p983_p1 = scmp.ne.s32.totalorder %s981_s22, %s982_s24  ;;  %p988_p2 = scmp.lt.s32.totalorder %s986_s11, %s982_s24 }
  0x3a   : > { %351 = vmatpush.msra.mxu3 %v249_v4  ;;  %v449_v36 = vand.u32 4294901760, %v426_v35  ;;  %v457_v50 = vand.u32 4294901760, %v429_v47 }
  0x3b   : > { %v253_v16 = vand.u32 4294901760, %v252_v12  ;;  %322 = vmatpush.msra.mxu2 %v289_v10  ;;  %v285_v17 = vsub.f32 %v283_v9, %v284_v13  ;;  %v291_v18 = vsub.f32 %v289_v10, %v290_v14  ;;  %382 = vmatpush.msrb.mxu0 %v284_v13  ;;  %v261_v20 = vand.u32 4294901760, %v260_v15  ;;  %p984_p4 = pnand %p983_p1, %p1140_p3  ;;  %p989_p9 = por %p988_p2, %p987_p11 }
  0x3c   : > { %325 = vmatmul.f32.vlgmr.msra.gmra.mxu2 %v252_v12  ;;  %v450_v44 = vsub.f32 %v426_v35, %v449_v36  ;;  %v458_v57 = vsub.f32 %v429_v47, %v457_v50 }
  0x3d   : > { %v254_v19 = vsub.f32 %v252_v12, %v253_v16  ;;  %355 = vmatmul.f32.vlgmr.msra.gmra.mxu3 %v253_v16  ;;  %v286_v21 = vand.u32 4294901760, %v285_v17  ;;  %v292_v22 = vand.u32 4294901760, %v291_v18  ;;  %386 = vmatpush.msrb.mxu0 %v290_v14  ;;  %v262_v24 = vsub.f32 %v260_v15, %v261_v20  ;;  %p985_p8 = pneg %p984_p4 }
  0x3e   : > { %v451_v49 = vand.u32 4294901760, %v450_v44  ;;  %v459_v62 = vand.u32 4294901760, %v458_v57 }
  0x3f   : > { %v255_v23 = vand.u32 4294901760, %v254_v19  ;;  %287 = vmatpush.msra.mxu1 %v286_v21  ;;  %v263_v25 = vand.u32 4294901760, %v262_v24  ;;  %p990_p10 = pnand %p989_p9, %p985_p8 }
  0x40   : > { %v452_v56 = vsub.f32 %v450_v44, %v451_v49 }
  0x41   : > { %256 = vmatmul.f32.vlgmr.msra.gmra.mxu0 %v255_v23  ;;  %293 = vmatpush.msra.mxu1 %v292_v22 }
  0x42   : > { %295 = vmatmul.f32.vlgmr.msra.gmra.mxu1 %v251_v7  ;;  %v453_v61 = vand.u32 4294901760, %v452_v56 }
  0x43   : > { %411 = vmatpush.msrb.mxu1 %v247_v3  ;;  %v460_v3 = vsub.f32 %v458_v57, %v459_v62 }
  0x44   : > { %330 = vmatmul.f32.gmra.mxu2 %v260_v15 }
  0x45   : > { %361 = vmatmul.f32.gmra.mxu3 %v261_v20  ;;  %413 = vmatpush.msrb.mxu1 %v249_v4  ;;  %v461_v8 = vand.u32 4294901760, %v460_v3 }
  0x49   : > { %264 = vmatmul.f32.gmra.mxu0 %v263_v25 }
  0x4a   : > { %299 = vmatmul.f32.gmra.mxu1 %v259_v11 }
  0x51   : > { %388 = vmatmul.f32.vlgmr.msrb.gmra.mxu0 %v251_v7 }
  0x52   : > { %415 = vmatmul.f32.vlgmr.msrb.gmra.mxu1 %v251_v7 }
  0x59   : > { %392 = vmatmul.f32.gmra.mxu0 %v259_v11 }
  0x5a   : > { %419 = vmatmul.f32.gmra.mxu1 %v259_v11 }
  0xbe   : > { %v257_v26 = vpop.f32.mrf.mxu0 }
  0xbf   : > { %v296_v27 = vpop.f32.mrf.mxu1  ;;  %v326_v28 = vpop.f32.mrf.mxu2 }
  0xc0   : > { %v297_v29 = vadd.f32 %v296_v27, %v257_v26  ;;  %v356_v32 = vpop.f32.mrf.mxu3 }
  0xc2   : > { %v327_v34 = vadd.f32 %v326_v28, %v297_v29 }
  0xc4   : > { %v357_v37 = vadd.f32 %v356_v32, %v327_v34 }
  0xc6   : > { %v265_v30 = vpop.f32.mrf.mxu0 }
  0xc7   : > { %v300_v33 = vpop.f32.mrf.mxu1  ;;  %v331_v39 = vpop.f32.mrf.mxu2 }
  0xc8   : > { %v301_v38 = vadd.f32 %v300_v33, %v265_v30  ;;  %v362_v48 = vpop.f32.mrf.mxu3 }
  0xca   : > { %v332_v45 = vadd.f32 %v331_v39, %v301_v38 }
  0xcc   : > { %v363_v51 = vadd.f32 %v362_v48, %v332_v45 }
  0xce   : > { %v389_v40 = vpop.f32.mrf.mxu0 }
  0xcf   : > { %v390_v42 = vadd.f32 %v389_v40, %v357_v37  ;;  %v416_v43 = vpop.f32.mrf.mxu1 }
  0xd1   : > { %v417_v46 = vadd.f32 %v416_v43, %v390_v42 }
  0xd3   : > { %v447_v52 = vand.u32 4294901760, %v417_v46 }
  0xd5   : > { %v487_v58 = vsub.f32 %v417_v46, %v447_v52 }
  0xd6   : > { %v393_v53 = vpop.f32.mrf.mxu0 }
  0xd7   : > { %v394_v54 = vadd.f32 %v393_v53, %v363_v51  ;;  %v420_v55 = vpop.f32.mrf.mxu1  ;;  %v488_v0 = vand.u32 4294901760, %v487_v58 }
  0xd9   : > { %v421_v59 = vadd.f32 %v420_v55, %v394_v54  ;;  %v489_v5 = vsub.f32 %v487_v58, %v488_v0 }
  0xdb   : > { %v445_v60 = vand.u32 4294901760, %v421_v59  ;;  %v490_v9 = vand.u32 4294901760, %v489_v5 }
  0xdd   : > { %v481_v63 = vsub.f32 %v421_v59, %v445_v60  ;;  %446 = vmatpush.msrb.mxu2 %v445_v60  ;;  %547 = vmatpush.msra.mxu1 %v445_v60 }
  0xdf   : > { %v482_v1 = vand.u32 4294901760, %v481_v63  ;;  %448 = vmatpush.msrb.mxu2 %v447_v52  ;;  %517 = vmatpush.msra.mxu0 %v481_v63 }
  0xe0   : > { %549 = vmatpush.msra.mxu1 %v447_v52  ;;  %454 = vmatmul.f32.vlgmr.msrb.gmra.mxu2 %v453_v61 }
  0xe1   : > { %520 = vmatpush.msra.mxu0 %v487_v58  ;;  %580 = vmatpush.msra.mxu2 %v482_v1  ;;  %v483_v4 = vsub.f32 %v481_v63, %v482_v1 }
  0xe2   : > { %523 = vmatmul.f32.vlgmr.msra.gmra.mxu0 %v450_v44  ;;  %553 = vmatmul.f32.vlgmr.msra.gmra.mxu1 %v451_v49 }
  0xe3   : > { %584 = vmatpush.msra.mxu2 %v488_v0  ;;  %v484_v7 = vand.u32 4294901760, %v483_v4 }
  0xe5   : > { %485 = vmatpush.msrb.mxu3 %v484_v7 }
  0xe7   : > { %491 = vmatpush.msrb.mxu3 %v490_v9 }
  0xe8   : > { %493 = vmatmul.f32.vlgmr.msrb.gmra.mxu3 %v449_v36  ;;  %462 = vmatmul.f32.gmra.mxu2 %v461_v8 }
  0xe9   : > { %609 = vmatpush.msra.mxu3 %v445_v60 }
  0xea   : > { %528 = vmatmul.f32.gmra.mxu0 %v458_v57  ;;  %559 = vmatmul.f32.gmra.mxu1 %v459_v62 }
  0xeb   : > { %611 = vmatpush.msra.mxu3 %v447_v52 }
  0xf0   : > { %497 = vmatmul.f32.gmra.mxu3 %v457_v50  ;;  %586 = vmatmul.f32.vlgmr.msra.gmra.mxu2 %v449_v36 }
  0xf8   : > { %613 = vmatmul.f32.vlgmr.msra.gmra.mxu3 %v449_v36  ;;  %590 = vmatmul.f32.gmra.mxu2 %v457_v50 }
 0x100   : > { %617 = vmatmul.f32.gmra.mxu3 %v457_v50 }
 0x15f   : > { %v524_v13 = vpop.f32.mrf.mxu0  ;;  %v554_v15 = vpop.f32.mrf.mxu1 }
 0x163   : > { %v455_v10 = vpop.f32.mrf.mxu2 }
 0x167   : > { %v529_v19 = vpop.f32.mrf.mxu0  ;;  %v560_v23 = vpop.f32.mrf.mxu1 }
 0x16b   : > { %v494_v11 = vpop.f32.mrf.mxu3  ;;  %v463_v12 = vpop.f32.mrf.mxu2 }
 0x16c   : > { %v495_v17 = vadd.f32 %v494_v11, %v455_v10 }
 0x16e   : > { %v525_v20 = vadd.f32 %v524_v13, %v495_v17 }
 0x170   : > { %v555_v24 = vadd.f32 %v554_v15, %v525_v20 }
 0x173   : > { %v498_v14 = vpop.f32.mrf.mxu3  ;;  %v587_v16 = vpop.f32.mrf.mxu2 }
 0x174   : > { %v499_v18 = vadd.f32 %v498_v14, %v463_v12  ;;  %v588_v26 = vadd.f32 %v587_v16, %v555_v24 }
 0x176   : > { %v530_v22 = vadd.f32 %v529_v19, %v499_v18 }
 0x178   : > { %v561_v27 = vadd.f32 %v560_v23, %v530_v22 }
 0x17b   : > { %v614_v21 = vpop.f32.mrf.mxu3  ;;  %v591_v25 = vpop.f32.mrf.mxu2 }
 0x17c   : > { %v615_v28 = vadd.f32 %v614_v21, %v588_v26  ;;  %v592_v29 = vadd.f32 %v591_v25, %v561_v27 }
 0x17e   : > { %v621_v32 = vsel %vm226_vm0, %v615_v28, inf  ;;  %v633_v36 = vsel %vm226_vm0, %v615_v28, -inf }
 0x183   : > { %v618_v30 = vpop.f32.mrf.mxu3 }
 0x184   : > { %v619_v31 = vadd.f32 %v618_v30, %v592_v29 }
 0x186   : > { %v622_v33 = vsel %vm226_vm0, %v619_v31, inf  ;;  %v634_v35 = vsel %vm226_vm0, %v619_v31, -inf }
 0x187   : > { %v623_v34 = vmin.f32 %v621_v32, %v622_v33  ;;  %v635_v37 = vmax.f32 %v633_v36, %v634_v35 }
 0x189   : > { %624 = vmin.xlane.f32.xlu0 %v623_v34 }
 0x191   : > { %636 = vmax.xlane.f32.xlu0 %v635_v37 }
 0x1fc   : > { %v625_v38 = vpop.xlane.xlu0 %624 }
 0x1fd   : > { %v626_v39 = vrot.slane %v625_v38, 4 }
 0x1ff   : > { %v627_v40 = vmin.f32 %v625_v38, %v626_v39 }
 0x201   : > { %v628_v41 = vrot.slane %v627_v40, 2 }
 0x203   : > { %v629_v42 = vmin.f32 %v627_v40, %v628_v41 }
 0x204   : > { %v637_v43 = vpop.xlane.xlu0 %636 }
 0x205   : > { %v638_v44 = vrot.slane %v637_v43, 4  ;;  %v630_v45 = vrot.slane %v629_v42, 1 }
 0x207   : > { %v639_v46 = vmax.f32 %v637_v43, %v638_v44  ;;  %v631_v47 = vmin.f32 %v629_v42, %v630_v45 }
 0x209   : > { %v640_v48 = vrot.slane %v639_v46, 2  ;;  %799 = vpush %v631_v47 }
 0x20b   : > { %v641_v49 = vmax.f32 %v639_v46, %v640_v48 }
 0x20d   : > { %v642_v50 = vrot.slane %v641_v49, 1 }
 0x20f   : > { %v643_v51 = vmax.f32 %v641_v49, %v642_v50 }
 0x211   : > { %801 = vpush %v643_v51 }
 0x23a   : > { %s800_s18 = spop %799 }
 0x23b   : > { %v645_v59 = vstv %s800_s18 }
 0x23c   : > { %v646_v62 = vsub.f32 %v615_v28, %v645_v59  ;;  %v647_v63 = vsub.f32 %v619_v31, %v645_v59 }
 0x242   : > { %s802_s26 = spop %801 }
 0x243   : > { %s648_s27 = ssub.f32 %s802_s26, %s800_s18 }
 0x245   : > { %s649_s28 = sadd.f32 1e-08, %s648_s27 }
 0x247   : > { %v650_v52 = vstv %s649_s28 }
 0x248   : > { %874 = vrcp.f32 %v650_v52  ;;  %v662_v56 = vand.u32 2147483648, %v650_v52  ;;  %v660_v58 = vand.u32 2147483647, %v650_v52  ;;  %vm656_vm2 = vweird.f32 %v650_v52 }
 0x24a   : > { %v663_v61 = vor.u32 1.1754944e-38, %v662_v56  ;;  %vm661_vm4 = vcmp.eq.f32.partialorder %v660_v58, 8.507059e+37 }
 0x24e   : > { %v875_v53 = vpop.eup %874 }
 0x24f   : > { %v652_v54 = vmul.f32 %v875_v53, %v650_v52  ;;  %vm657_vm1 = vweird.f32 %v875_v53 }
 0x250   : > { %vm658_vm3 = vmor %vm656_vm2, %vm657_vm1 }
 0x251   : > { %v653_v55 = vsub.f32 1.0, %v652_v54 }
 0x253   : > { %v654_v57 = vmul.f32 %v875_v53, %v653_v55 }
 0x255   : > { %v655_v60 = vadd.f32 %v875_v53, %v654_v57 }
 0x257   : > { %v659_v0 = vsel %vm658_vm3, %v875_v53, %v655_v60 }
 0x258   : > { %v664_v1 = vsel %vm661_vm4, %v663_v61, %v659_v0 }
 0x259   : > { %v665_v3 = vmul.f32 %v664_v1, %v646_v62  ;;  %v666_v4 = vmul.f32 %v664_v1, %v647_v63 }
 0x25b   : > { %v667_v5 = vmax.f32 %v665_v3, %v1192_v2  ;;  %v668_v7 = vmax.f32 %v666_v4, %v1196_v6 }
 0x25d   : > { %669 = vst.msk [vmem:[%s221_s17] sm:$0xff] %vm226_vm0, %v667_v5 }
 0x25e   : > { %670 = vst.msk [vmem:[%s221_s17 + $0x8] sm:$0xff] %vm226_vm0, %v668_v7 }
 0x25f   : > { %993 = shalt.err (!%p990_p10)
}
 0x260   : > { %s1046_s30 = smov 128   ;;  %s1047_s26 = smov 8  }
 0x261   : > { %813 = dma.vmem_to_hbm [thread:$0]  (%p1140_p3), %s685_s16, 256, %s687_s21, %s672_s20, %s1046_s30, %s1046_s30, %s1047_s26  }
 0x262 PF: > { %s701_s27 = sand.u32 1, %s1028_s12   ;;  %p1254_p12 = scmp.ge.s32.totalorder %s1040_s15, 2 }
 0x263   : > { %s702_s28 = scalar_lea.sflag [#allocation4], %s701_s27 }
 0x264   : > { %p827_p13 = pnand %p1254_p12, %p1103_p6 }
 0x266   : > { %p828_p0 = pneg %p827_p13 }
 0x268   : > { %1023 = dma.done.wait (%p828_p0), %s702_s28, 256  }
 0x269   : > { %1025 = vsyncadd (%p828_p0), %s702_s28, 4294967040  ;;  %p15_p5 = scmp.ge.s32.totalorder %s1130_s6, 4   ;;  %s1255_s12 = smov %s1032_s13 }
 0x26a   : > { %s1256_s13 = smov %s1036_s14  ;;  %s1257_s14 = smov %s1145_s10 }
 0x26b   : > { %s1258_s15 = smov %s1130_s6  ;;  %17 = sbr.rel (!%p15_p5) target bundleno = 5 (0x5), region = 84 }
 0x270   :  { %708 = vsyncpa [#allocation3], 1 }
 0x271   :  { %710 = vsyncpa [#allocation3 + $0x1], 1 }
 0x272   :  { %711 = vsyncpa [#allocation6], 1 }
 0x273   :  { %712 = vsyncpa [#allocation4], 1 }
 0x274   :  { %714 = vsyncpa [#allocation4 + $0x1], 1 }

</bundles_post_ra>
